<compile_context>
chip_gen: v5e
topology: v5e:2x2
jax: 0.10.0
libtpu: 0.0.40
codegen_flags: <defaults>
</compile_context>

<pallas_src>
import functools

import jax
import jax.numpy as jnp
from jax.experimental import pallas as pl
from jax.experimental.pallas import tpu as pltpu


def _round_up(x, m):
    return ((x + m - 1) // m) * m


def _cluster_loss_kernel(b_actual, tb, n, needs_mask,
                         w_ref, anchor_ref, neighbor_ref, out_ref,
                         psum_ref, logsum_ref):
    pid = pl.program_id(0)
    last = pl.num_programs(0) - 1

    @pl.when(pid == 0)
    def _():
        psum_ref[...] = jnp.zeros_like(psum_ref)
        logsum_ref[...] = jnp.zeros_like(logsum_ref)

    a = anchor_ref[...].astype(jnp.float32)      # (TB, N)
    nb = neighbor_ref[...].astype(jnp.float32)   # (TB, N)

    # Numerically stable softmax pieces; denominators folded into sim.
    a_max = jnp.max(a, axis=1, keepdims=True)
    a_exp = jnp.exp(a - a_max)
    a_sum = jnp.sum(a_exp, axis=1, keepdims=True)
    a_inv = pl.reciprocal(a_sum, approx=False)   # exact: test tolerance 1e-5

    n_max = jnp.max(nb, axis=1, keepdims=True)
    n_exp = jnp.exp(nb - n_max)
    n_sum = jnp.sum(n_exp, axis=1, keepdims=True)
    n_inv = pl.reciprocal(n_sum, approx=False)

    # sim = <softmax(a), softmax(n)> = sum(a_exp * n_exp) / (a_sum * n_sum)
    sim = jnp.sum(a_exp * n_exp, axis=1, keepdims=True) * a_inv * n_inv  # (TB,1)

    # F.binary_cross_entropy(sim, ones): -log(sim), each term clamped at -100.
    log_sim = jnp.maximum(jnp.log(sim), -100.0)

    # anchor probs only needed for the entropy term: broadcast multiply.
    a_probs = a_exp * a_inv                                              # (TB,N)

    if needs_mask:
        row = jax.lax.broadcasted_iota(jnp.int32, (tb, 1), 0) + pid * tb
        valid = (row < b_actual).astype(jnp.float32)                     # (TB,1)
        log_sim = log_sim * valid
        a_probs = a_probs * valid

    logsum_ref[...] += jnp.sum(log_sim, axis=0, keepdims=True)           # (1,1)
    psum_ref[...] += jnp.sum(a_probs, axis=0, keepdims=True)             # (1,N)

    @pl.when(pid == last)
    def _():
        inv_b = jnp.float32(1.0 / b_actual)
        consistency = -(jnp.sum(logsum_ref[...]) * inv_b)
        p = jnp.maximum(psum_ref[...] * inv_b, 1e-10)                    # (1,N)
        entropy = -jnp.sum(p * jnp.log(p))
        w = w_ref[0]
        out_ref[0] = consistency - w * entropy
        out_ref[1] = consistency
        out_ref[2] = entropy


def _choose_tb(b, n):
    # Keep each f32 input block <= ~2 MiB so that
    # 2 inputs x 2 pipeline buffers <= ~8 MiB (safe even on v7x's 64 MiB VMEM).
    max_elems = (2 * 1024 * 1024) // 4
    tb = max(8, (max_elems // max(n, 1)) // 8 * 8)
    tb = min(tb, _round_up(b, 8))
    return tb


def cluster_loss(anchor_logits, neighbor_logits, entropy_weight=2.0):
    """Returns (loss, consistency_loss, entropy_loss) as scalars."""
    assert anchor_logits.shape == neighbor_logits.shape
    assert anchor_logits.ndim == 2
    b, n = anchor_logits.shape

    tb = _choose_tb(b, n)
    padded_b = _round_up(b, tb)
    needs_mask = padded_b != b
    if needs_mask:
        pad = ((0, padded_b - b), (0, 0))
        anchor_logits = jnp.pad(anchor_logits, pad)
        neighbor_logits = jnp.pad(neighbor_logits, pad)

    grid = (padded_b // tb,)
    w = jnp.asarray([entropy_weight], dtype=jnp.float32)

    kernel = functools.partial(_cluster_loss_kernel, b, tb, n, needs_mask)

    out = pl.pallas_call(
        kernel,
        out_shape=jax.ShapeDtypeStruct((3,), jnp.float32),
        grid=grid,
        in_specs=[
            pl.BlockSpec(memory_space=pltpu.MemorySpace.SMEM),   # entropy weight
            pl.BlockSpec((tb, n), lambda i: (i, 0)),             # anchor tile
            pl.BlockSpec((tb, n), lambda i: (i, 0)),             # neighbor tile
        ],
        out_specs=pl.BlockSpec(memory_space=pltpu.MemorySpace.SMEM),
        scratch_shapes=[
            pltpu.VMEM((1, n), jnp.float32),   # running sum of anchor probs
            pltpu.VMEM((1, 1), jnp.float32),   # running sum of clamped log(sim)
        ],
        compiler_params=pltpu.CompilerParams(
            dimension_semantics=("arbitrary",),   # batch axis feeds accumulators
            vmem_limit_bytes=32 * 1024 * 1024,
        ),
    )(w, anchor_logits, neighbor_logits)
    return out[0], out[1], out[2]


def _reference(anchor_logits, neighbor_logits, entropy_weight=2.0):
    a_probs = jax.nn.softmax(anchor_logits.astype(jnp.float32), axis=1)
    n_probs = jax.nn.softmax(neighbor_logits.astype(jnp.float32), axis=1)
    sim = jnp.sum(a_probs * n_probs, axis=1)
    consistency = -jnp.mean(jnp.maximum(jnp.log(sim), -100.0))
    p = jnp.maximum(jnp.mean(a_probs, axis=0), 1e-10)
    entropy = -jnp.sum(p * jnp.log(p))
    return consistency - entropy_weight * entropy, consistency, entropy


if __name__ == "__main__":
    key = jax.random.PRNGKey(0)
    k1, k2 = jax.random.split(key)
    b, n = 8, 16  # batch=8, num_clusters=16
    anchor_logits = jax.random.normal(k1, (b, n), dtype=jnp.float32)
    neighbor_logits = jax.random.normal(k2, (b, n), dtype=jnp.float32)

    loss, cons, ent = cluster_loss(anchor_logits, neighbor_logits, entropy_weight=2.0)
    jax.block_until_ready(loss)

    ref_loss, ref_cons, ref_ent = _reference(anchor_logits, neighbor_logits, 2.0)
    assert jnp.allclose(loss, ref_loss, atol=1e-5), (loss, ref_loss)
    assert jnp.allclose(cons, ref_cons, atol=1e-5), (cons, ref_cons)
    assert jnp.allclose(ent, ref_ent, atol=1e-5), (ent, ref_ent)

    print("KERNEL_OK")
</pallas_src>

<mosaic_0001>
module attributes {stable_mosaic.version = 11 : i64} {
  func.func @_cluster_loss_kernel(%arg0: i32, %arg1: memref<1xf32, #tpu.memory_space<smem>>, %arg2: memref<8x16xf32, #tpu.memory_space<vmem>>, %arg3: memref<8x16xf32, #tpu.memory_space<vmem>>, %arg4: memref<3xf32, #tpu.memory_space<smem>>, %arg5: memref<1x16xf32, #tpu.memory_space<vmem>>, %arg6: memref<1x1xf32, #tpu.memory_space<vmem>>) attributes {dimension_semantics = [#tpu.dimension_semantics<arbitrary>], iteration_bounds = array<i64: 1>, scalar_prefetch = 0 : i64, scratch_operands = 2 : i64, tpu.core_type = #tpu.core_type<tc>, window_params = [{transform_indices = @transform_0, window_bounds = array<i64: 1>}, {transform_indices = @transform_1, window_bounds = array<i64: 8, 16>}, {transform_indices = @transform_2, window_bounds = array<i64: 8, 16>}, {transform_indices = @transform_3, window_bounds = array<i64: 3>}]} {
    %c0_i32 = arith.constant 0 : i32
    %0 = arith.cmpi eq, %arg0, %c0_i32 : i32
    %1 = arith.extui %0 : i1 to i32
    %c0_i32_0 = arith.constant 0 : i32
    %2 = arith.cmpi ne, %1, %c0_i32_0 : i32
    scf.if %2 {
      %cst_21 = arith.constant 0.000000e+00 : f32
      %44 = vector.broadcast %cst_21 : f32 to vector<1x16xf32>
      %c0_22 = arith.constant 0 : index
      %c0_23 = arith.constant 0 : index
      %45 = vector.load %arg5[%c0_22, %c0_23] : memref<1x16xf32, #tpu.memory_space<vmem>>, vector<1x16xf32>
      tpu.vector_store %arg5[%c0_22, %c0_23], %44 {strides = array<i32>} : memref<1x16xf32, #tpu.memory_space<vmem>>, vector<1x16xf32>,
      %cst_24 = arith.constant 0.000000e+00 : f32
      %46 = vector.broadcast %cst_24 : f32 to vector<1x1xf32>
      %c0_25 = arith.constant 0 : index
      %c0_26 = arith.constant 0 : index
      %47 = vector.load %arg6[%c0_25, %c0_26] : memref<1x1xf32, #tpu.memory_space<vmem>>, vector<1x1xf32>
      tpu.vector_store %arg6[%c0_25, %c0_26], %46 {strides = array<i32>} : memref<1x1xf32, #tpu.memory_space<vmem>>, vector<1x1xf32>,
    } else {
    }
    %c0 = arith.constant 0 : index
    %c0_1 = arith.constant 0 : index
    %3 = vector.load %arg2[%c0, %c0_1] : memref<8x16xf32, #tpu.memory_space<vmem>>, vector<8x16xf32>
    %c0_2 = arith.constant 0 : index
    %c0_3 = arith.constant 0 : index
    %4 = vector.load %arg3[%c0_2, %c0_3] : memref<8x16xf32, #tpu.memory_space<vmem>>, vector<8x16xf32>
    %cst = arith.constant dense<0xFF800000> : vector<8xf32>
    %5 = vector.multi_reduction <maximumf>, %3, %cst [1] : vector<8x16xf32> to vector<8xf32>
    %6 = vector.shape_cast %5 : vector<8xf32> to vector<8x1xf32>
    %7 = vector.broadcast %6 : vector<8x1xf32> to vector<8x16xf32>
    %8 = arith.subf %3, %7 : vector<8x16xf32>
    %9 = math.exp %8 : vector<8x16xf32>
    %cst_4 = arith.constant dense<0.000000e+00> : vector<8xf32>
    %10 = vector.multi_reduction <add>, %9, %cst_4 [1] : vector<8x16xf32> to vector<8xf32>
    %11 = vector.shape_cast %10 : vector<8xf32> to vector<8x1xf32>
    %12 = tpu.reciprocal %11 : vector<8x1xf32> -> vector<8x1xf32>
    %cst_5 = arith.constant dense<0xFF800000> : vector<8xf32>
    %13 = vector.multi_reduction <maximumf>, %4, %cst_5 [1] : vector<8x16xf32> to vector<8xf32>
    %14 = vector.shape_cast %13 : vector<8xf32> to vector<8x1xf32>
    %15 = vector.broadcast %14 : vector<8x1xf32> to vector<8x16xf32>
    %16 = arith.subf %4, %15 : vector<8x16xf32>
    %17 = math.exp %16 : vector<8x16xf32>
    %cst_6 = arith.constant dense<0.000000e+00> : vector<8xf32>
    %18 = vector.multi_reduction <add>, %17, %cst_6 [1] : vector<8x16xf32> to vector<8xf32>
    %19 = vector.shape_cast %18 : vector<8xf32> to vector<8x1xf32>
    %20 = tpu.reciprocal %19 : vector<8x1xf32> -> vector<8x1xf32>
    %21 = arith.mulf %9, %17 : vector<8x16xf32>
    %cst_7 = arith.constant dense<0.000000e+00> : vector<8xf32>
    %22 = vector.multi_reduction <add>, %21, %cst_7 [1] : vector<8x16xf32> to vector<8xf32>
    %23 = vector.shape_cast %22 : vector<8xf32> to vector<8x1xf32>
    %24 = arith.mulf %23, %12 : vector<8x1xf32>
    %25 = arith.mulf %24, %20 : vector<8x1xf32>
    %26 = math.log %25 : vector<8x1xf32>
    %cst_8 = arith.constant -1.000000e+02 : f32
    %27 = vector.broadcast %cst_8 : f32 to vector<8x1xf32>
    %28 = arith.maximumf %26, %27 : vector<8x1xf32>
    %29 = vector.broadcast %12 : vector<8x1xf32> to vector<8x16xf32>
    %30 = arith.mulf %9, %29 : vector<8x16xf32>
    %c0_9 = arith.constant 0 : index
    %c0_10 = arith.constant 0 : index
    %31 = vector.load %arg6[%c0_9, %c0_10] : memref<1x1xf32, #tpu.memory_space<vmem>>, vector<1x1xf32>
    %cst_11 = arith.constant dense<0.000000e+00> : vector<1xf32>
    %32 = vector.multi_reduction <add>, %28, %cst_11 [0] : vector<8x1xf32> to vector<1xf32>
    %33 = vector.shape_cast %32 : vector<1xf32> to vector<1x1xf32>
    %34 = arith.addf %31, %33 : vector<1x1xf32>
    %c0_12 = arith.constant 0 : index
    %c0_13 = arith.constant 0 : index
    %35 = vector.load %arg6[%c0_12, %c0_13] : memref<1x1xf32, #tpu.memory_space<vmem>>, vector<1x1xf32>
    tpu.vector_store %arg6[%c0_12, %c0_13], %34 {strides = array<i32>} : memref<1x1xf32, #tpu.memory_space<vmem>>, vector<1x1xf32>,
    %c0_14 = arith.constant 0 : index
    %c0_15 = arith.constant 0 : index
    %36 = vector.load %arg5[%c0_14, %c0_15] : memref<1x16xf32, #tpu.memory_space<vmem>>, vector<1x16xf32>
    %cst_16 = arith.constant dense<0.000000e+00> : vector<16xf32>
    %37 = vector.multi_reduction <add>, %30, %cst_16 [0] : vector<8x16xf32> to vector<16xf32>
    %38 = vector.shape_cast %37 : vector<16xf32> to vector<1x16xf32>
    %39 = arith.addf %36, %38 : vector<1x16xf32>
    %c0_17 = arith.constant 0 : index
    %c0_18 = arith.constant 0 : index
    %40 = vector.load %arg5[%c0_17, %c0_18] : memref<1x16xf32, #tpu.memory_space<vmem>>, vector<1x16xf32>
    tpu.vector_store %arg5[%c0_17, %c0_18], %39 {strides = array<i32>} : memref<1x16xf32, #tpu.memory_space<vmem>>, vector<1x16xf32>,
    %c0_i32_19 = arith.constant 0 : i32
    %41 = arith.cmpi eq, %arg0, %c0_i32_19 : i32
    %42 = arith.extui %41 : i1 to i32
    %c0_i32_20 = arith.constant 0 : i32
    %43 = arith.cmpi ne, %42, %c0_i32_20 : i32
    scf.if %43 {
      %c0_21 = arith.constant 0 : index
      %c0_22 = arith.constant 0 : index
      %44 = vector.load %arg6[%c0_21, %c0_22] : memref<1x1xf32, #tpu.memory_space<vmem>>, vector<1x1xf32>
      %45 = vector.shape_cast %44 : vector<1x1xf32> to vector<1x1x1xf32>
      %cst_23 = arith.constant dense<0.000000e+00> : vector<1xf32>
      %46 = vector.multi_reduction <add>, %45, %cst_23 [1, 2] : vector<1x1x1xf32> to vector<1xf32>
      %47 = vector.shape_cast %46 : vector<1xf32> to vector<1x1x1xf32>
      %48 = vector.extract %47[0, 0, 0] : f32 from vector<1x1x1xf32>
      %cst_24 = arith.constant 1.250000e-01 : f32
      %49 = arith.mulf %48, %cst_24 : f32
      %cst_25 = arith.constant 0.000000e+00 : f32
      %50 = arith.subf %cst_25, %49 : f32
      %c0_26 = arith.constant 0 : index
      %c0_27 = arith.constant 0 : index
      %51 = vector.load %arg5[%c0_26, %c0_27] : memref<1x16xf32, #tpu.memory_space<vmem>>, vector<1x16xf32>
      %cst_28 = arith.constant 1.250000e-01 : f32
      %52 = vector.broadcast %cst_28 : f32 to vector<1x16xf32>
      %53 = arith.mulf %51, %52 : vector<1x16xf32>
      %cst_29 = arith.constant 1.000000e-10 : f32
      %54 = vector.broadcast %cst_29 : f32 to vector<1x16xf32>
      %55 = arith.maximumf %53, %54 : vector<1x16xf32>
      %56 = math.log %55 : vector<1x16xf32>
      %57 = arith.mulf %55, %56 : vector<1x16xf32>
      %58 = vector.shape_cast %57 : vector<1x16xf32> to vector<1x1x16xf32>
      %cst_30 = arith.constant dense<0.000000e+00> : vector<1xf32>
      %59 = vector.multi_reduction <add>, %58, %cst_30 [1, 2] : vector<1x1x16xf32> to vector<1xf32>
      %60 = vector.shape_cast %59 : vector<1xf32> to vector<1x1x1xf32>
      %61 = vector.extract %60[0, 0, 0] : f32 from vector<1x1x1xf32>
      %cst_31 = arith.constant 0.000000e+00 : f32
      %62 = arith.subf %cst_31, %61 : f32
      %c0_32 = arith.constant 0 : index
      %63 = memref.load %arg1[%c0_32] : memref<1xf32, #tpu.memory_space<smem>>
      %64 = arith.mulf %63, %62 : f32
      %65 = arith.subf %50, %64 : f32
      %c0_33 = arith.constant 0 : index
      %66 = memref.load %arg4[%c0_33] : memref<3xf32, #tpu.memory_space<smem>>
      memref.store %65, %arg4[%c0_33] : memref<3xf32, #tpu.memory_space<smem>>
      %c1 = arith.constant 1 : index
      %67 = memref.load %arg4[%c1] : memref<3xf32, #tpu.memory_space<smem>>
      memref.store %50, %arg4[%c1] : memref<3xf32, #tpu.memory_space<smem>>
      %c2 = arith.constant 2 : index
      %68 = memref.load %arg4[%c2] : memref<3xf32, #tpu.memory_space<smem>>
      memref.store %62, %arg4[%c2] : memref<3xf32, #tpu.memory_space<smem>>
    } else {
    }
    return
  }
  func.func @transform_0(%arg0: i32) -> i32 {
    %c0_i32 = arith.constant 0 : i32
    %c0_i32_0 = arith.constant 0 : i32
    return %c0_i32 : i32
  }
  func.func @transform_1(%arg0: i32) -> (i32, i32) {
    %c0_i32 = arith.constant 0 : i32
    %c0_i32_0 = arith.constant 0 : i32
    return %arg0, %c0_i32 : i32, i32
  }
  func.func @transform_2(%arg0: i32) -> (i32, i32) {
    %c0_i32 = arith.constant 0 : i32
    %c0_i32_0 = arith.constant 0 : i32
    return %arg0, %c0_i32 : i32, i32
  }
  func.func @transform_3(%arg0: i32) -> i32 {
    %c0_i32 = arith.constant 0 : i32
    %c0_i32_0 = arith.constant 0 : i32
    return %c0_i32 : i32
  }
}

</mosaic_0001>

<bundles_post_ra>
// kernel: tpu_custom_call.1
= control target key start
LH: loop header
LB: loop body
LE: loop exit
PB: predicated region body
PF: predicated region fallthrough
CT: control target
= control target key end

     0   :  { %9 = vsyncpa [#allocation6], 0  ;;  %s316_s0 = inlined_call_operand.<no memory space> [shape: f32[1], index: 0, kind: input, shape index: {}]   ;;  %s317_s1 = inlined_call_operand.hbm [shape: f32[8,16], index: 1, kind: input, shape index: {}]   ;;  %s318_s2 = inlined_call_operand.hbm [shape: f32[8,16], index: 2, kind: input, shape index: {}]   ;;  %s319_s3 = inlined_call_operand.hbm [shape: f32[3], index: 3, kind: output, shape index: {}]  }
   0x1   :  { %10 = vsyncpa [#allocation9], 0 }
   0x2   :  { %11 = vsyncpa [#allocation7], 0  ;;  %s19_s14 = sshll.u32 %s317_s1, 4  ;;  %s269_s15 = smov [#allocation5]   ;;  %s20_s14 = int_to_ptr.hbm [resolvable:$true] %s19_s14 }
   0x3   :  { %s21_s16 = sshll.u32 %s269_s15, 4  ;;  %s30_s19 = sshll.u32 %s318_s2, 4  ;;  %s22_s16 = int_to_ptr.vmem [resolvable:$true] %s21_s16  ;;  %s31_s19 = int_to_ptr.hbm [resolvable:$true] %s30_s19 }
   0x4   :  { %24 = dma.hbm_to_vmem [thread:$0]  %s20_s14, 128, %s22_s16, [#allocation6]  }
   0x5   :  { %s270_s20 = smov [#allocation8]  }
   0x6   :  { %s32_s21 = sshll.u32 %s270_s20, 4  ;;  %s33_s21 = int_to_ptr.vmem [resolvable:$true] %s32_s21 }
   0x7   :  { %35 = dma.hbm_to_vmem [thread:$0]  %s31_s19, 128, %s33_s21, [#allocation9]  }
   0x8   :  { %263 = dma.done.wait [#allocation6], 128  }
   0x9   :  { %264 = vsyncadd [#allocation6], 4294967168 }
   0xa   :  { %265 = dma.done.wait [#allocation9], 128  }
   0xb   :  { %266 = vsyncadd [#allocation9], 4294967168  ;;  %vm54_vm0 = vcmask 130048   ;;  %v53_v0 = vld [vmem:[#allocation8] sm:$0xff]  ;;  %v52_v1 = vld [vmem:[#allocation5] sm:$0xff]  ;;  %vm50_vm1 = vcmask 0  }
   0xc   :  { %v78_v2 = vsel %vm54_vm0, %v53_v0, -inf  ;;  %v55_v3 = vsel %vm54_vm0, %v52_v1, -inf  ;;  %v271_v16 = vmov 0.0   ;;  %vm48_vm2 = vcmask 122880   ;;  %s171_s27 = sshll.u32 %s319_s3, 4  ;;  %s272_s5 = smov [#allocation10]   ;;  %s172_s27 = int_to_ptr.hbm [resolvable:$true] %s171_s27 }
   0xd   :  { %79 = vmax.xlane.f32.xlu1 %v78_v2  ;;  %56 = vmax.xlane.f32.xlu0 %v55_v3  ;;  %51 = vst.msk [vmem:[#allocation3] sm:$0x1] %vm50_vm1, %v271_v16 }
   0xe   :  { %49 = vst.msk [vmem:[#allocation2] sm:$0x1] %vm48_vm2, %v271_v16 }
  0x14   :  { %v111_v60 = vld [vmem:[#allocation3] sm:$0x1] }
  0x15   :  { %v121_v51 = vld [vmem:[#allocation2] sm:$0x1] }
  0x80   :  { %v80_v4 = vpop.xlane.xlu1 %79  ;;  %v57_v5 = vpop.xlane.xlu0 %56 }
  0x81   :  { %v81_v6 = vsub.f32 %v53_v0, %v80_v4  ;;  %v58_v7 = vsub.f32 %v52_v1, %v57_v5 }
  0x83   :  { %v82_v8 = vmul.f32 1.442695, %v81_v6  ;;  %v59_v9 = vmul.f32 1.442695, %v58_v7 }
  0x85   :  { %191 = vpow2.f32 %v82_v8 }
  0x86   :  { %193 = vpow2.f32 %v59_v9 }
  0x8b   :  { %v192_v10 = vpop.eup %191 }
  0x8c   :  { %v194_v11 = vpop.eup %193  ;;  %v84_v12 = vsel %vm54_vm0, %v192_v10, 0.0 }
  0x8d   :  { %v61_v13 = vsel %vm54_vm0, %v194_v11, 0.0  ;;  %85 = vadd.xlane.f32.xlu1 %v84_v12  ;;  %v101_v14 = vmul.f32 %v194_v11, %v192_v10 }
  0x8e   :  { %62 = vadd.xlane.f32.xlu0 %v61_v13 }
  0x8f   :  { %v102_v15 = vsel %vm54_vm0, %v101_v14, 0.0 }
  0x90   :  { %103 = vadd.xlane.f32.xlu2 %v102_v15 }
 0x100   :  { %v86_v17 = vpop.xlane.xlu1 %85 }
 0x101   :  { %v63_v18 = vpop.xlane.xlu0 %62  ;;  %195 = vrcp.f32 %v86_v17  ;;  %vm92_vm3 = vweird.f32 %v86_v17  ;;  %v98_v24 = vand.u32 2147483648, %v86_v17  ;;  %v96_v26 = vand.u32 2147483647, %v86_v17 }
 0x102   :  { %197 = vrcp.f32 %v63_v18  ;;  %v75_v27 = vand.u32 2147483648, %v63_v18  ;;  %v73_v30 = vand.u32 2147483647, %v63_v18  ;;  %vm69_vm7 = vweird.f32 %v63_v18 }
 0x103   :  { %v99_v31 = vor.u32 1.1754944e-38, %v98_v24  ;;  %vm97_vm8 = vcmp.eq.f32.partialorder %v96_v26, 8.507059e+37  ;;  %v104_v38 = vpop.xlane.xlu2 %103 }
 0x104   :  { %v76_v35 = vor.u32 1.1754944e-38, %v75_v27  ;;  %vm74_vm10 = vcmp.eq.f32.partialorder %v73_v30, 8.507059e+37 }
 0x107   :  { %v196_v19 = vpop.eup %195 }
 0x108   :  { %v198_v20 = vpop.eup %197  ;;  %v88_v21 = vmul.f32 %v196_v19, %v86_v17  ;;  %vm93_vm4 = vweird.f32 %v196_v19 }
 0x109   :  { %v65_v22 = vmul.f32 %v198_v20, %v63_v18  ;;  %vm94_vm5 = vmor %vm92_vm3, %vm93_vm4  ;;  %vm70_vm6 = vweird.f32 %v198_v20 }
 0x10a   :  { %v89_v23 = vsub.f32 1.0, %v88_v21  ;;  %vm71_vm9 = vmor %vm69_vm7, %vm70_vm6 }
 0x10b   :  { %v66_v25 = vsub.f32 1.0, %v65_v22 }
 0x10c   :  { %v90_v28 = vmul.f32 %v196_v19, %v89_v23 }
 0x10d   :  { %v67_v29 = vmul.f32 %v198_v20, %v66_v25 }
 0x10e   :  { %v91_v32 = vadd.f32 %v196_v19, %v90_v28 }
 0x10f   :  { %v68_v33 = vadd.f32 %v198_v20, %v67_v29 }
 0x110   :  { %v95_v34 = vsel %vm94_vm5, %v196_v19, %v91_v32 }
 0x111   :  { %v72_v36 = vsel %vm71_vm9, %v198_v20, %v68_v33  ;;  %v100_v37 = vsel %vm97_vm8, %v99_v31, %v95_v34 }
 0x112   :  { %v77_v39 = vsel %vm74_vm10, %v76_v35, %v72_v36 }
 0x113   :  { %v105_v40 = vmul.f32 %v104_v38, %v77_v39  ;;  %v110_v41 = vmul.f32 %v194_v11, %v77_v39 }
 0x115   :  { %v106_v42 = vmul.f32 %v105_v40, %v100_v37  ;;  %v122_v43 = vsel %vm54_vm0, %v110_v41, 0.0 }
 0x116   :  { %v123_v44 = vrot.slane %v122_v43, 4 }
 0x117   :  { %199 = vlog2.f32 %v106_v42 }
 0x118   :  { %v124_v45 = vadd.f32 %v123_v44, %v122_v43 }
 0x11a   :  { %v125_v46 = vrot.slane %v124_v45, 2 }
 0x11c   :  { %v126_v47 = vadd.f32 %v125_v46, %v124_v45 }
 0x11d   :  { %v200_v48 = vpop.eup %199 }
 0x11e   :  { %v108_v49 = vmul.f32 0.6931472, %v200_v48  ;;  %v127_v50 = vrot.slane %v126_v47, 1 }
 0x120   :  { %v109_v52 = vmax.f32 %v108_v49, -100.0  ;;  %v128_v53 = vadd.f32 %v127_v50, %v126_v47 }
 0x122   :  { %v112_v54 = vrot.slane %v109_v52, 4  ;;  %v129_v55 = vadd.f32 %v128_v53, %v121_v51 }
 0x124   :  { %v113_v56 = vadd.f32 %v112_v54, %v109_v52  ;;  %131 = vst.msk [vmem:[#allocation2] sm:$0x1] %vm48_vm2, %v129_v55 }
 0x126   :  { %v114_v57 = vrot.slane %v113_v56, 2 }
 0x128   :  { %v115_v58 = vadd.f32 %v114_v57, %v113_v56 }
 0x12a   :  { %v116_v59 = vrot.slane %v115_v58, 1 }
 0x12b   :  { %v140_v61 = vld [vmem:[#allocation2] sm:$0x1] }
 0x12c   :  { %v117_v62 = vadd.f32 %v116_v59, %v115_v58  ;;  %v141_v63 = vmul.f32 0.125, %v140_v61 }
 0x12e   :  { %v118_v0 = vadd.f32 %v117_v62, %v111_v60  ;;  %v142_v1 = vmax.f32 %v141_v63, 1e-10 }
 0x130   :  { %120 = vst.msk [vmem:[#allocation3] sm:$0x1] %vm50_vm1, %v118_v0  ;;  %201 = vlog2.f32 %v142_v1 }
 0x136   :  { %v202_v2 = vpop.eup %201 }
 0x137   :  { %v135_v3 = vld [vmem:[#allocation3] sm:$0x1]  ;;  %v144_v4 = vmul.f32 0.6931472, %v202_v2 }
 0x138   :  { %183 = vpush %v135_v3 }
 0x139   :  { %v145_v5 = vmul.f32 %v144_v4, %v142_v1 }
 0x13b   :  { %v146_v6 = vsel %vm48_vm2, %v145_v5, 0.0 }
 0x13c   :  { %147 = vadd.xlane.f32.xlu2 %v146_v6 }
 0x169   :  { %s184_s1 = spop %183 }
 0x16a   :  { %s138_s2 = smul.f32 0.125, %s184_s1 }
 0x16c   :  { %s139_s22 = ssub.f32 0.0, %s138_s2 }
 0x16e   :  { %163 = sst [smem:[#allocation10 + $0x1]] %s139_s22 }
 0x1af   :  { %v148_v7 = vpop.xlane.xlu2 %147 }
 0x1b0   :  { %v149_v8 = vrot.slane %v148_v7, 4 }
 0x1b2   :  { %v150_v9 = vadd.f32 %v149_v8, %v148_v7 }
 0x1b4   :  { %v151_v10 = vrot.slane %v150_v9, 2 }
 0x1b6   :  { %v152_v11 = vadd.f32 %v151_v10, %v150_v9 }
 0x1b8   :  { %v153_v12 = vrot.slane %v152_v11, 1 }
 0x1ba   :  { %v154_v13 = vadd.f32 %v153_v12, %v152_v11 }
 0x1bc   :  { %185 = vpush %v154_v13 }
 0x1ed   :  { %s186_s23 = spop %185 }
 0x1ee   :  { %s156_s24 = ssub.f32 0.0, %s186_s23 }
 0x1f0   :  { %s158_s30 = smul.f32 %s156_s24, %s316_s0  ;;  %165 = sst [smem:[#allocation10 + $0x2]] %s156_s24 }
 0x1f2   :  { %s159_s4 = ssub.f32 %s139_s22, %s158_s30 }
 0x1f4   :  { %161 = sst [smem:[#allocation10]] %s159_s4 }
 0x1f5   :  { %174 = dma.smem_to_hbm %s272_s5, 16, %s172_s27, [#allocation7]  }
 0x1f6   :  { %267 = dma.done.wait [#allocation7], 16  }
 0x1f7   :  { %268 = vsyncadd [#allocation7], 4294967280 }
 0x1f8   :  { %179 = sfence }
 0x1f9   :  { %180 = vsyncpa [#allocation6], 1 }
 0x1fa   :  { %181 = vsyncpa [#allocation9], 1 }
 0x1fb   :  { %182 = vsyncpa [#allocation7], 1 }

</bundles_post_ra>
